<compile_context>
chip_gen: v5e
topology: v5e:2x2
jax: 0.10.0
libtpu: 0.0.40
codegen_flags: <defaults>
</compile_context>

<pallas_src>
import functools

import jax
import jax.numpy as jnp
from jax import lax
from jax.experimental import pallas as pl
from jax.experimental.pallas import tpu as pltpu

LANES = 128
SUBLANES = 8
MAX_BLOCK_ROWS = 2048    # 2048 x 128 f32 = 1 MiB per input block
NUM_CORE_SPLITS = 2      # shard the reduction across both TensorCores (v7x)


def _round_up(v, m):
    return (v + m - 1) // m * m


def _bce_dice_kernel(x_ref, t_ref, o_ref, acc_inter, acc_sum, acc_bce, *,
                     steps_per_split, total_blocks, valid_rows_last):
    c = pl.program_id(0)            # core-split index ("parallel")
    i = pl.program_id(1)            # streaming step within a split ("arbitrary")
    gb = c * steps_per_split + i    # global block index
    block_rows = x_ref.shape[0]

    @pl.when(i == 0)
    def _init():
        acc_inter[...] = jnp.zeros_like(acc_inter)
        acc_sum[...] = jnp.zeros_like(acc_sum)
        acc_bce[...] = jnp.zeros_like(acc_bce)

    def accumulate(masked):
        x = x_ref[...].astype(jnp.float32)
        t = t_ref[...].astype(jnp.float32)
        prod = x * t
        sxt = x + t
        # BCEWithLogitsLoss, numerically stable: max(x,0) - x*t + log1p(exp(-|x|))
        bce = jnp.maximum(x, 0.0) - prod + jnp.log1p(jnp.exp(-jnp.abs(x)))
        if masked:
            # Only the globally-last (possibly partial) block pays for masking.
            row_ids = lax.broadcasted_iota(jnp.int32, (block_rows, LANES), 0)
            m = row_ids < valid_rows_last
            prod = jnp.where(m, prod, 0.0)
            sxt = jnp.where(m, sxt, 0.0)
            bce = jnp.where(m, bce, 0.0)
        # Reduce each tile to one vreg (pure VPU adds), then a single (8,128)
        # read-modify-write per accumulator per step.
        acc_inter[...] += prod.reshape(-1, SUBLANES, LANES).sum(axis=0)
        acc_sum[...] += sxt.reshape(-1, SUBLANES, LANES).sum(axis=0)
        acc_bce[...] += bce.reshape(-1, SUBLANES, LANES).sum(axis=0)

    last_partial = valid_rows_last != block_rows  # static Python bool

    if last_partial:
        @pl.when(gb < total_blocks - 1)
        def _full():
            accumulate(masked=False)

        @pl.when(gb == total_blocks - 1)
        def _tail():
            accumulate(masked=True)
    else:
        # Skip entirely for the (clamped) over-run steps of the second split.
        @pl.when(gb < total_blocks)
        def _full():
            accumulate(masked=False)

    @pl.when(i == pl.num_programs(1) - 1)
    def _finalize():
        o_ref[0, 0, :, :] = acc_inter[...]
        o_ref[0, 1, :, :] = acc_sum[...]
        o_ref[0, 2, :, :] = acc_bce[...]


def bce_dice_loss(inputs, targets, smooth=1e-06, *, max_block_rows=MAX_BLOCK_ROWS):
    """Pallas TPU implementation of BCEDiceLoss.forward. Returns a scalar f32."""
    x = jnp.ravel(inputs)            # native dtype; cast to f32 happens in-kernel
    t = jnp.ravel(targets)
    n = x.shape[0]

    n_tail = n % LANES
    n_main = n - n_tail

    # <128-element tail: cheaper as a tiny jnp expression than padding/copying both
    # full tensors just to lane-align them.
    if n_tail:
        xt = x[n_main:].astype(jnp.float32)
        tt = t[n_main:].astype(jnp.float32)
        inter = jnp.sum(xt * tt)
        s_xt = jnp.sum(xt + tt)
        bce_sum = jnp.sum(jnp.maximum(xt, 0.0) - xt * tt
                          + jnp.log1p(jnp.exp(-jnp.abs(xt))))
    else:
        inter = jnp.float32(0.0)
        s_xt = jnp.float32(0.0)
        bce_sum = jnp.float32(0.0)

    if n_main:
        rows = n_main // LANES
        x2 = x[:n_main].reshape(rows, LANES)
        t2 = t[:n_main].reshape(rows, LANES)

        block_rows = min(max_block_rows, _round_up(rows, SUBLANES))
        total_blocks = pl.cdiv(rows, block_rows)
        num_splits = NUM_CORE_SPLITS if total_blocks >= NUM_CORE_SPLITS else 1
        steps_per_split = pl.cdiv(total_blocks, num_splits)
        valid_rows_last = rows - (total_blocks - 1) * block_rows

        # Only clamp the block index when the split is uneven (odd block count);
        # clamped over-run steps re-fetch the last block and are skipped in-kernel.
        if num_splits * steps_per_split != total_blocks:
            def in_map(c, i):
                return (jnp.minimum(c * steps_per_split + i, total_blocks - 1), 0)
        else:
            def in_map(c, i):
                return (c * steps_per_split + i, 0)

        kernel = functools.partial(
            _bce_dice_kernel,
            steps_per_split=steps_per_split,
            total_blocks=total_blocks,
            valid_rows_last=valid_rows_last,
        )

        partials = pl.pallas_call(
            kernel,
            out_shape=jax.ShapeDtypeStruct(
                (num_splits, 3, SUBLANES, LANES), jnp.float32),
            grid=(num_splits, steps_per_split),
            in_specs=[
                pl.BlockSpec((block_rows, LANES), in_map),
                pl.BlockSpec((block_rows, LANES), in_map),
            ],
            out_specs=pl.BlockSpec((1, 3, SUBLANES, LANES),
                                   lambda c, i: (c, 0, 0, 0)),
            scratch_shapes=[
                pltpu.VMEM((SUBLANES, LANES), jnp.float32),  # sum(x*t) partials
                pltpu.VMEM((SUBLANES, LANES), jnp.float32),  # sum(x)+sum(t) partials
                pltpu.VMEM((SUBLANES, LANES), jnp.float32),  # BCE partials
            ],
            compiler_params=pltpu.CompilerParams(
                dimension_semantics=("parallel", "arbitrary"),
            ),
        )(x2, t2)

        sums = jnp.sum(partials, axis=(0, 2, 3))  # (3,) — tiny wrapper-side reduce
        inter = inter + sums[0]
        s_xt = s_xt + sums[1]
        bce_sum = bce_sum + sums[2]

    smooth_f = jnp.float32(smooth)
    dice_score = (2.0 * inter + smooth_f) / (s_xt + smooth_f)
    return bce_sum / jnp.float32(n) + (1.0 - dice_score)


def bce_dice_loss_ref(inputs, targets, smooth=1e-06):
    """Pure-JAX reference matching PyTorch BCEDiceLoss.forward."""
    x = jnp.ravel(inputs).astype(jnp.float32)
    t = jnp.ravel(targets).astype(jnp.float32)
    bce = jnp.mean(jnp.maximum(x, 0.0) - x * t + jnp.log1p(jnp.exp(-jnp.abs(x))))
    inter = jnp.sum(x * t)
    dice_score = (2.0 * inter + smooth) / (jnp.sum(x) + jnp.sum(t) + smooth)
    return bce + (1.0 - dice_score)


if __name__ == "__main__":
    key = jax.random.PRNGKey(0)
    k1, k2, k3, k4 = jax.random.split(key, 4)

    # Segmentation-head logits / binary mask: [N, C, H, W]
    shape = (2, 4, 16, 16)
    inputs = jax.random.normal(k1, shape, dtype=jnp.float32)              # raw logits
    targets = (jax.random.uniform(k2, shape) > 0.5).astype(jnp.float32)   # binary mask

    ref = bce_dice_loss_ref(inputs, targets)

    # 1) Default path (single block).
    loss = jax.block_until_ready(bce_dice_loss(inputs, targets))
    assert jnp.allclose(loss, ref, rtol=1e-5, atol=1e-5), (loss, ref)

    # 2) Two-way core split, even block count, no tail.
    loss2 = jax.block_until_ready(bce_dice_loss(inputs, targets, max_block_rows=8))
    assert jnp.allclose(loss2, ref, rtol=1e-5, atol=1e-5), (loss2, ref)

    # 3) Odd block count (clamped split), partial last block, unaligned tail.
    shape3 = (2, 3, 17, 23)  # 2346 elements: 18 lane-rows + 42-element tail
    inputs3 = jax.random.normal(k3, shape3, dtype=jnp.float32)
    targets3 = (jax.random.uniform(k4, shape3) > 0.5).astype(jnp.float32)
    ref3 = bce_dice_loss_ref(inputs3, targets3)
    loss3 = jax.block_until_ready(bce_dice_loss(inputs3, targets3, max_block_rows=8))
    assert jnp.allclose(loss3, ref3, rtol=1e-5, atol=1e-5), (loss3, ref3)

    print("KERNEL_OK")
</pallas_src>

<mosaic_0001>
module attributes {stable_mosaic.version = 11 : i64} {
  func.func @_bce_dice_kernel(%arg0: i32, %arg1: i32, %arg2: memref<16x128xf32, #tpu.memory_space<vmem>>, %arg3: memref<16x128xf32, #tpu.memory_space<vmem>>, %arg4: memref<1x3x8x128xf32, #tpu.memory_space<vmem>>, %arg5: memref<8x128xf32, #tpu.memory_space<vmem>>, %arg6: memref<8x128xf32, #tpu.memory_space<vmem>>, %arg7: memref<8x128xf32, #tpu.memory_space<vmem>>) attributes {dimension_semantics = [#tpu.dimension_semantics<parallel>, #tpu.dimension_semantics<arbitrary>], iteration_bounds = array<i64: 1, 1>, scalar_prefetch = 0 : i64, scratch_operands = 3 : i64, tpu.core_type = #tpu.core_type<tc>, window_params = [{transform_indices = @transform_0, window_bounds = array<i64: 16, 128>}, {transform_indices = @transform_1, window_bounds = array<i64: 16, 128>}, {transform_indices = @transform_2, window_bounds = array<i64: 1, 3, 8, 128>}]} {
    %c1_i32 = arith.constant 1 : i32
    %0 = arith.muli %arg0, %c1_i32 : i32
    %1 = arith.addi %0, %arg1 : i32
    %c0_i32 = arith.constant 0 : i32
    %2 = arith.cmpi eq, %arg1, %c0_i32 : i32
    %3 = arith.extui %2 : i1 to i32
    %c0_i32_0 = arith.constant 0 : i32
    %4 = arith.cmpi ne, %3, %c0_i32_0 : i32
    scf.if %4 {
      %cst = arith.constant 0.000000e+00 : f32
      %11 = vector.broadcast %cst : f32 to vector<8x128xf32>
      %c0 = arith.constant 0 : index
      %c0_5 = arith.constant 0 : index
      %12 = vector.load %arg5[%c0, %c0_5] : memref<8x128xf32, #tpu.memory_space<vmem>>, vector<8x128xf32>
      tpu.vector_store %arg5[%c0, %c0_5], %11 {strides = array<i32>} : memref<8x128xf32, #tpu.memory_space<vmem>>, vector<8x128xf32>,
      %cst_6 = arith.constant 0.000000e+00 : f32
      %13 = vector.broadcast %cst_6 : f32 to vector<8x128xf32>
      %c0_7 = arith.constant 0 : index
      %c0_8 = arith.constant 0 : index
      %14 = vector.load %arg6[%c0_7, %c0_8] : memref<8x128xf32, #tpu.memory_space<vmem>>, vector<8x128xf32>
      tpu.vector_store %arg6[%c0_7, %c0_8], %13 {strides = array<i32>} : memref<8x128xf32, #tpu.memory_space<vmem>>, vector<8x128xf32>,
      %cst_9 = arith.constant 0.000000e+00 : f32
      %15 = vector.broadcast %cst_9 : f32 to vector<8x128xf32>
      %c0_10 = arith.constant 0 : index
      %c0_11 = arith.constant 0 : index
      %16 = vector.load %arg7[%c0_10, %c0_11] : memref<8x128xf32, #tpu.memory_space<vmem>>, vector<8x128xf32>
      tpu.vector_store %arg7[%c0_10, %c0_11], %15 {strides = array<i32>} : memref<8x128xf32, #tpu.memory_space<vmem>>, vector<8x128xf32>,
    } else {
    }
    %c1_i32_1 = arith.constant 1 : i32
    %5 = arith.cmpi slt, %1, %c1_i32_1 : i32
    %6 = arith.extui %5 : i1 to i32
    %c0_i32_2 = arith.constant 0 : i32
    %7 = arith.cmpi ne, %6, %c0_i32_2 : i32
    scf.if %7 {
      %c0 = arith.constant 0 : index
      %c0_5 = arith.constant 0 : index
      %11 = vector.load %arg2[%c0, %c0_5] : memref<16x128xf32, #tpu.memory_space<vmem>>, vector<16x128xf32>
      %c0_6 = arith.constant 0 : index
      %c0_7 = arith.constant 0 : index
      %12 = vector.load %arg3[%c0_6, %c0_7] : memref<16x128xf32, #tpu.memory_space<vmem>>, vector<16x128xf32>
      %13 = arith.mulf %11, %12 : vector<16x128xf32>
      %14 = arith.addf %11, %12 : vector<16x128xf32>
      %cst = arith.constant 0.000000e+00 : f32
      %15 = vector.broadcast %cst : f32 to vector<16x128xf32>
      %16 = arith.maximumf %11, %15 : vector<16x128xf32>
      %17 = arith.subf %16, %13 : vector<16x128xf32>
      %18 = math.absf %11 : vector<16x128xf32>
      %cst_8 = arith.constant 0.000000e+00 : f32
      %19 = vector.broadcast %cst_8 : f32 to vector<16x128xf32>
      %20 = arith.subf %19, %18 : vector<16x128xf32>
      %21 = math.exp %20 : vector<16x128xf32>
      %22 = math.log1p %21 : vector<16x128xf32>
      %23 = arith.addf %17, %22 : vector<16x128xf32>
      %c0_9 = arith.constant 0 : index
      %c0_10 = arith.constant 0 : index
      %24 = vector.load %arg5[%c0_9, %c0_10] : memref<8x128xf32, #tpu.memory_space<vmem>>, vector<8x128xf32>
      %25 = vector.shape_cast %13 : vector<16x128xf32> to vector<2x8x128xf32>
      %cst_11 = arith.constant dense<0.000000e+00> : vector<8x128xf32>
      %26 = vector.multi_reduction <add>, %25, %cst_11 [0] : vector<2x8x128xf32> to vector<8x128xf32>
      %27 = arith.addf %24, %26 : vector<8x128xf32>
      %c0_12 = arith.constant 0 : index
      %c0_13 = arith.constant 0 : index
      %28 = vector.load %arg5[%c0_12, %c0_13] : memref<8x128xf32, #tpu.memory_space<vmem>>, vector<8x128xf32>
      tpu.vector_store %arg5[%c0_12, %c0_13], %27 {strides = array<i32>} : memref<8x128xf32, #tpu.memory_space<vmem>>, vector<8x128xf32>,
      %c0_14 = arith.constant 0 : index
      %c0_15 = arith.constant 0 : index
      %29 = vector.load %arg6[%c0_14, %c0_15] : memref<8x128xf32, #tpu.memory_space<vmem>>, vector<8x128xf32>
      %30 = vector.shape_cast %14 : vector<16x128xf32> to vector<2x8x128xf32>
      %cst_16 = arith.constant dense<0.000000e+00> : vector<8x128xf32>
      %31 = vector.multi_reduction <add>, %30, %cst_16 [0] : vector<2x8x128xf32> to vector<8x128xf32>
      %32 = arith.addf %29, %31 : vector<8x128xf32>
      %c0_17 = arith.constant 0 : index
      %c0_18 = arith.constant 0 : index
      %33 = vector.load %arg6[%c0_17, %c0_18] : memref<8x128xf32, #tpu.memory_space<vmem>>, vector<8x128xf32>
      tpu.vector_store %arg6[%c0_17, %c0_18], %32 {strides = array<i32>} : memref<8x128xf32, #tpu.memory_space<vmem>>, vector<8x128xf32>,
      %c0_19 = arith.constant 0 : index
      %c0_20 = arith.constant 0 : index
      %34 = vector.load %arg7[%c0_19, %c0_20] : memref<8x128xf32, #tpu.memory_space<vmem>>, vector<8x128xf32>
      %35 = vector.shape_cast %23 : vector<16x128xf32> to vector<2x8x128xf32>
      %cst_21 = arith.constant dense<0.000000e+00> : vector<8x128xf32>
      %36 = vector.multi_reduction <add>, %35, %cst_21 [0] : vector<2x8x128xf32> to vector<8x128xf32>
      %37 = arith.addf %34, %36 : vector<8x128xf32>
      %c0_22 = arith.constant 0 : index
      %c0_23 = arith.constant 0 : index
      %38 = vector.load %arg7[%c0_22, %c0_23] : memref<8x128xf32, #tpu.memory_space<vmem>>, vector<8x128xf32>
      tpu.vector_store %arg7[%c0_22, %c0_23], %37 {strides = array<i32>} : memref<8x128xf32, #tpu.memory_space<vmem>>, vector<8x128xf32>,
    } else {
    }
    %c0_i32_3 = arith.constant 0 : i32
    %8 = arith.cmpi eq, %arg1, %c0_i32_3 : i32
    %9 = arith.extui %8 : i1 to i32
    %c0_i32_4 = arith.constant 0 : i32
    %10 = arith.cmpi ne, %9, %c0_i32_4 : i32
    scf.if %10 {
      %c0 = arith.constant 0 : index
      %c0_5 = arith.constant 0 : index
      %11 = vector.load %arg5[%c0, %c0_5] : memref<8x128xf32, #tpu.memory_space<vmem>>, vector<8x128xf32>
      %c0_6 = arith.constant 0 : index
      %c0_7 = arith.constant 0 : index
      %c0_8 = arith.constant 0 : index
      %c0_9 = arith.constant 0 : index
      %12 = vector.load %arg4[%c0_6, %c0_7, %c0_8, %c0_9] : memref<1x3x8x128xf32, #tpu.memory_space<vmem>>, vector<1x1x8x128xf32>
      %13 = vector.shape_cast %12 : vector<1x1x8x128xf32> to vector<8x128xf32>
      %14 = vector.shape_cast %11 : vector<8x128xf32> to vector<1x1x8x128xf32>
      tpu.vector_store %arg4[%c0_6, %c0_7, %c0_8, %c0_9], %14 {strides = array<i32>} : memref<1x3x8x128xf32, #tpu.memory_space<vmem>>, vector<1x1x8x128xf32>,
      %c0_10 = arith.constant 0 : index
      %c0_11 = arith.constant 0 : index
      %15 = vector.load %arg6[%c0_10, %c0_11] : memref<8x128xf32, #tpu.memory_space<vmem>>, vector<8x128xf32>
      %c0_12 = arith.constant 0 : index
      %c1 = arith.constant 1 : index
      %c0_13 = arith.constant 0 : index
      %c0_14 = arith.constant 0 : index
      %16 = vector.load %arg4[%c0_12, %c1, %c0_13, %c0_14] : memref<1x3x8x128xf32, #tpu.memory_space<vmem>>, vector<1x1x8x128xf32>
      %17 = vector.shape_cast %16 : vector<1x1x8x128xf32> to vector<8x128xf32>
      %18 = vector.shape_cast %15 : vector<8x128xf32> to vector<1x1x8x128xf32>
      tpu.vector_store %arg4[%c0_12, %c1, %c0_13, %c0_14], %18 {strides = array<i32>} : memref<1x3x8x128xf32, #tpu.memory_space<vmem>>, vector<1x1x8x128xf32>,
      %c0_15 = arith.constant 0 : index
      %c0_16 = arith.constant 0 : index
      %19 = vector.load %arg7[%c0_15, %c0_16] : memref<8x128xf32, #tpu.memory_space<vmem>>, vector<8x128xf32>
      %c0_17 = arith.constant 0 : index
      %c2 = arith.constant 2 : index
      %c0_18 = arith.constant 0 : index
      %c0_19 = arith.constant 0 : index
      %20 = vector.load %arg4[%c0_17, %c2, %c0_18, %c0_19] : memref<1x3x8x128xf32, #tpu.memory_space<vmem>>, vector<1x1x8x128xf32>
      %21 = vector.shape_cast %20 : vector<1x1x8x128xf32> to vector<8x128xf32>
      %22 = vector.shape_cast %19 : vector<8x128xf32> to vector<1x1x8x128xf32>
      tpu.vector_store %arg4[%c0_17, %c2, %c0_18, %c0_19], %22 {strides = array<i32>} : memref<1x3x8x128xf32, #tpu.memory_space<vmem>>, vector<1x1x8x128xf32>,
    } else {
    }
    return
  }
  func.func @transform_0(%arg0: i32, %arg1: i32) -> (i32, i32) {
    %c1_i32 = arith.constant 1 : i32
    %0 = arith.muli %arg0, %c1_i32 : i32
    %1 = arith.addi %0, %arg1 : i32
    %c0_i32 = arith.constant 0 : i32
    %c0_i32_0 = arith.constant 0 : i32
    return %1, %c0_i32 : i32, i32
  }
  func.func @transform_1(%arg0: i32, %arg1: i32) -> (i32, i32) {
    %c1_i32 = arith.constant 1 : i32
    %0 = arith.muli %arg0, %c1_i32 : i32
    %1 = arith.addi %0, %arg1 : i32
    %c0_i32 = arith.constant 0 : i32
    %c0_i32_0 = arith.constant 0 : i32
    return %1, %c0_i32 : i32, i32
  }
  func.func @transform_2(%arg0: i32, %arg1: i32) -> (i32, i32, i32, i32) {
    %c0_i32 = arith.constant 0 : i32
    %c0_i32_0 = arith.constant 0 : i32
    %c0_i32_1 = arith.constant 0 : i32
    %c0_i32_2 = arith.constant 0 : i32
    return %arg0, %c0_i32, %c0_i32_0, %c0_i32_1 : i32, i32, i32, i32
  }
}

</mosaic_0001>

<bundles_post_ra>
// kernel: tpu_custom_call.1
= control target key start
LH: loop header
LB: loop body
LE: loop exit
PB: predicated region body
PF: predicated region fallthrough
CT: control target
= control target key end

     0   :  { %7 = vsyncpa [#allocation6], 0  ;;  %s280_s0 = inlined_call_operand.hbm [shape: f32[16,128], index: 0, kind: input, shape index: {}]   ;;  %s281_s1 = inlined_call_operand.hbm [shape: f32[16,128], index: 1, kind: input, shape index: {}]   ;;  %s282_s2 = inlined_call_operand.hbm [shape: f32[1,3,8,128], index: 2, kind: output, shape index: {}]  }
   0x1   :  { %8 = vsyncpa [#allocation9], 0 }
   0x2   :  { %9 = vsyncpa [#allocation7], 0  ;;  %s18_s11 = sshll.u32 %s280_s0, 4  ;;  %s242_s12 = smov [#allocation5]   ;;  %s19_s11 = int_to_ptr.hbm [resolvable:$true] %s18_s11 }
   0x3   :  { %s20_s13 = sshll.u32 %s242_s12, 4  ;;  %s35_s16 = sshll.u32 %s281_s1, 4  ;;  %s21_s13 = int_to_ptr.vmem [resolvable:$true] %s20_s13  ;;  %s36_s16 = int_to_ptr.hbm [resolvable:$true] %s35_s16 }
   0x4   :  { %s243_s17 = smov 128   ;;  %s244_s18 = smov 8  }
   0x5   :  { %26 = dma.hbm_to_vmem [thread:$0]  %s19_s11, 256, %s21_s13, [#allocation6], %s243_s17, %s243_s17, %s244_s18  }
   0x6   :  { %s245_s19 = smov [#allocation8]  }
   0x7   :  { %s37_s20 = sshll.u32 %s245_s19, 4  ;;  %s38_s20 = int_to_ptr.vmem [resolvable:$true] %s37_s20 }
   0x8   :  { %43 = dma.hbm_to_vmem [thread:$0]  %s36_s16, 256, %s38_s20, [#allocation9], %s243_s17, %s243_s17, %s244_s18  }
   0x9   :  { %236 = dma.done.wait [#allocation6], 256  }
   0xa   :  { %237 = vsyncadd [#allocation6], 4294967040 }
   0xb   :  { %238 = dma.done.wait [#allocation9], 256  }
   0xc   :  { %239 = vsyncadd [#allocation9], 4294967040  ;;  %v68_v0 = vld [vmem:[#allocation5] sm:$0xff]  ;;  %v69_v1 = vld [vmem:[#allocation5 + $0x8] sm:$0xff]  ;;  %s246_s0 = smov [#allocation10]   ;;  %s137_s23 = sshll.u32 %s282_s2, 4  ;;  %s138_s23 = int_to_ptr.hbm [resolvable:$true] %s137_s23 }
   0xd   :  { %v70_v2 = vld [vmem:[#allocation8] sm:$0xff]  ;;  %v71_v3 = vld [vmem:[#allocation8 + $0x8] sm:$0xff]  ;;  %v80_v4 = vand.u32 2147483647, %v68_v0  ;;  %v81_v5 = vand.u32 2147483647, %v69_v1 }
   0xe   :  { %v74_v6 = vadd.f32 %v70_v2, %v68_v0  ;;  %v72_v7 = vmul.f32 %v70_v2, %v68_v0  ;;  %v73_v8 = vmul.f32 %v71_v3, %v69_v1  ;;  %v75_v9 = vadd.f32 %v71_v3, %v69_v1  ;;  %s135_s1 = sshll.u32 %s246_s0, 4  ;;  %s136_s1 = int_to_ptr.vmem [resolvable:$true] %s135_s1 }
   0xf   :  { %v82_v10 = vsub.f32 0.0, %v80_v4  ;;  %v83_v11 = vsub.f32 0.0, %v81_v5  ;;  %v76_v23 = vmax.f32 %v68_v0, 0.0  ;;  %v77_v26 = vmax.f32 %v69_v1, 0.0 }
  0x10   :  { %v109_v12 = vadd.f32 %v73_v8, %v72_v7  ;;  %v113_v13 = vadd.f32 %v75_v9, %v74_v6 }
  0x11   :  { %v84_v14 = vmul.f32 1.442695, %v82_v10  ;;  %v86_v15 = vmul.f32 1.442695, %v83_v11  ;;  %v78_v30 = vsub.f32 %v76_v23, %v72_v7  ;;  %v79_v33 = vsub.f32 %v77_v26, %v73_v8 }
  0x12   :  { %124 = vst [vmem:[#allocation10] sm:$0xff] %v109_v12 }
  0x13   :  { %156 = vpow2.f32 %v84_v14  ;;  %127 = vst [vmem:[#allocation10 + $0x8] sm:$0xff] %v113_v13 }
  0x14   :  { %158 = vpow2.f32 %v86_v15 }
  0x19   :  { %v157_v16 = vpop.eup %156 }
  0x1a   :  { %v159_v17 = vpop.eup %158  ;;  %v88_v18 = vadd.f32 1.0, %v157_v16  ;;  %v91_v19 = vmul.f32 -0.5, %v157_v16  ;;  %v94_v24 = vand.u32 2147483647, %v157_v16 }
  0x1b   :  { %v97_v20 = vadd.f32 1.0, %v159_v17  ;;  %v100_v21 = vmul.f32 -0.5, %v159_v17  ;;  %v103_v27 = vand.u32 2147483647, %v159_v17 }
  0x1c   :  { %160 = vlog2.f32 %v88_v18  ;;  %v92_v22 = vadd.f32 1.0, %v91_v19  ;;  %vm95_vm0 = vcmp.lt.f32.partialorder %v94_v24, 0.0004427343 }
  0x1d   :  { %162 = vlog2.f32 %v97_v20  ;;  %v101_v25 = vadd.f32 1.0, %v100_v21  ;;  %vm104_vm1 = vcmp.lt.f32.partialorder %v103_v27, 0.0004427343 }
  0x1e   :  { %v93_v28 = vmul.f32 %v157_v16, %v92_v22 }
  0x1f   :  { %v102_v31 = vmul.f32 %v159_v17, %v101_v25 }
  0x22   :  { %v161_v29 = vpop.eup %160 }
  0x23   :  { %v163_v32 = vpop.eup %162  ;;  %v90_v34 = vmul.f32 0.6931472, %v161_v29 }
  0x24   :  { %v99_v35 = vmul.f32 0.6931472, %v163_v32 }
  0x25   :  { %v96_v36 = vsel %vm95_vm0, %v93_v28, %v90_v34 }
  0x26   :  { %v105_v37 = vsel %vm104_vm1, %v102_v31, %v99_v35  ;;  %v106_v38 = vadd.f32 %v96_v36, %v78_v30 }
  0x27   :  { %v107_v39 = vadd.f32 %v105_v37, %v79_v33 }
  0x29   :  { %v117_v40 = vadd.f32 %v107_v39, %v106_v38 }
  0x2b   :  { %130 = vst [vmem:[#allocation10 + $0x10] sm:$0xff] %v117_v40 }
  0x2c   :  { %143 = dma.vmem_to_hbm [thread:$0]  %s136_s1, 384, %s138_s23, [#allocation7], %s243_s17, %s243_s17, %s244_s18  }
  0x2d   :  { %240 = dma.done.wait [#allocation7], 384  }
  0x2e   :  { %241 = vsyncadd [#allocation7], 4294966912 }
  0x2f   :  { %148 = vsyncpa [#allocation6], 1 }
  0x30   :  { %149 = vsyncpa [#allocation9], 1 }
  0x31   :  { %150 = vsyncpa [#allocation7], 1 }

</bundles_post_ra>
